<compile_context>
chip_gen: v6e
topology: v6e:2x2x1
jax: 0.10.0
libtpu: 0.0.40
codegen_flags: <defaults>
</compile_context>

<pallas_src>
import math
import functools

import jax
import jax.numpy as jnp
from jax.experimental import pallas as pl
from jax.experimental.pallas import tpu as pltpu

F32 = jnp.float32

# ----------------------------- configuration (small, consistent with the module) ---------------
BATCH = 2
RESOLUTION = 16
TEXT_SEQ = 8
TEXT_EMBED_DIM = 16
INITIAL_CHANNELS = 8
SCALE_MULT = (2, 2)                    # scale_channel_multipliers (last two equal, as in default)
TIME_EMBED_DIM = INITIAL_CHANNELS * 4  # = 32
NUM_BLOCKS_PER_SCALE = 1
SELF_ATTN_IDS = frozenset([1])
CROSS_ATTN_IDS = frozenset([1])
NUM_GROUPS = 4
NUM_HEADS = 4
NUM_DIFFUSION_STEPS = 100

# linear beta noise schedule
BETAS = jnp.linspace(1e-4, 0.02, NUM_DIFFUSION_STEPS, dtype=F32)
ALPHA_BARS = jnp.cumprod(1.0 - BETAS)


# ----------------------------- in-kernel helpers ------------------------------------------------
def _silu(x):
    return x * jax.nn.sigmoid(x)


def _gelu_tanh(x):
    c = math.sqrt(2.0 / math.pi)
    return 0.5 * x * (1.0 + jnp.tanh(c * (x + 0.044715 * x * x * x)))


# ----------------------------- dense (row) GEMMs with fused activations -------------------------
def _dense_kernel(a_ref, w_ref, b_ref, o_ref, *, act_in, act_out):
    a = a_ref[...]
    if act_in == "silu":
        a = _silu(a)
    y = jnp.dot(a, w_ref[...], preferred_element_type=jnp.float32) + b_ref[...]
    if act_out == "gelu":
        y = _gelu_tanh(y)
    elif act_out == "silu":
        y = _silu(y)
    o_ref[...] = y


def dense(x2d, p, act_in=None, act_out=None):
    """x:(M,K) @ p.w^T + b with optional fused input / output activation (SiLU / GELU)."""
    M, K = x2d.shape
    N = p["w"].shape[0]
    return pl.pallas_call(
        functools.partial(_dense_kernel, act_in=act_in, act_out=act_out),
        out_shape=jax.ShapeDtypeStruct((M, N), F32),
    )(x2d.astype(F32), jnp.transpose(p["w"]).astype(F32), p["b"].reshape(1, N).astype(F32))


def _dense_ln_kernel(a_ref, w_ref, b_ref, g_ref, be_ref, o_ref, *, act_in, eps):
    a = a_ref[...]
    if act_in == "silu":
        a = _silu(a)
    y = jnp.dot(a, w_ref[...], preferred_element_type=jnp.float32) + b_ref[...]
    n = y.shape[-1]
    mean = jnp.sum(y, axis=-1, keepdims=True) / n
    var = jnp.sum((y - mean) ** 2, axis=-1, keepdims=True) / n
    o_ref[...] = (y - mean) * jax.lax.rsqrt(var + eps) * g_ref[...] + be_ref[...]


def dense_ln(x2d, p, gamma, beta, act_in=None, eps=1e-5):
    """[SiLU ->] Linear -> LayerNorm, fused in one kernel (cross-attention context MLPs)."""
    M, K = x2d.shape
    N = p["w"].shape[0]
    return pl.pallas_call(
        functools.partial(_dense_ln_kernel, act_in=act_in, eps=eps),
        out_shape=jax.ShapeDtypeStruct((M, N), F32),
    )(x2d.astype(F32), jnp.transpose(p["w"]).astype(F32), p["b"].reshape(1, N).astype(F32),
      gamma.reshape(1, N).astype(F32), beta.reshape(1, N).astype(F32))


# ----------------------------- im2col glue (NCHW, channels-on-sublanes layout) ------------------
def _im2col_3x3(x_nchw):
    B, C, H, W = x_nchw.shape
    xp = jnp.pad(x_nchw, ((0, 0), (0, 0), (1, 1), (1, 1)))
    cols = [xp[:, :, ky:ky + H, kx:kx + W] for ky in range(3) for kx in range(3)]
    return jnp.concatenate(cols, axis=1).reshape(B, 9 * C, H * W)


def _im2col_4x4_s2(x_nchw):
    B, C, H, W = x_nchw.shape
    Ho, Wo = H // 2, W // 2
    xp = jnp.pad(x_nchw, ((0, 0), (0, 0), (1, 1), (1, 1)))
    cols = [xp[:, :, ky:ky + 2 * Ho:2, kx:kx + 2 * Wo:2] for ky in range(4) for kx in range(4)]
    return jnp.concatenate(cols, axis=1).reshape(B, 16 * C, Ho * Wo)


# ----------------------------- fused ConvBlock kernel (conv GEMM + GN + FiLM + SiLU) ------------
def _conv_gn_film_silu_kernel(p_ref, w_ref, b_ref, g_ref, be_ref, sc_ref, sh_ref, o_ref,
                              *, groups, out_mult, eps):
    # p_ref: (1, K, P) im2col patches of one batch element; w_ref: (C, K); output: (1, C, P).
    y = jnp.dot(w_ref[...], p_ref[0], preferred_element_type=jnp.float32) + b_ref[...]
    C, P = y.shape
    cg = C // groups
    cnt = float(cg * P)
    gid_full = jax.lax.broadcasted_iota(jnp.int32, (C, P), 0) // cg
    gid_col = jax.lax.broadcasted_iota(jnp.int32, (C, 1), 0) // cg
    mean_c = jnp.zeros((C, 1), jnp.float32)
    rstd_c = jnp.zeros((C, 1), jnp.float32)
    for g in range(groups):                          # static unroll (groups = 4)
        msk = gid_full == g
        m = jnp.sum(jnp.where(msk, y, 0.0)) / cnt
        v = jnp.sum(jnp.where(msk, (y - m) ** 2, 0.0)) / cnt
        r = jax.lax.rsqrt(v + eps)
        mean_c = jnp.where(gid_col == g, m, mean_c)
        rstd_c = jnp.where(gid_col == g, r, rstd_c)
    h = (y - mean_c) * rstd_c * g_ref[...] + be_ref[...]
    h = h * (sc_ref[0] + 1.0) + sh_ref[0]            # FiLM (scale+1, shift); zeros when absent
    h = _silu(h)
    if out_mult != 1.0:
        h = h * out_mult                             # fused `residual(x) + x` (== 2*h) of the ref
    o_ref[0] = h


def conv_block(x_nchw, p, scale_shift, out_mult=1.0):
    """ConvBlock: conv3x3 -> GroupNorm(4) -> optional FiLM -> SiLU, one fused kernel per batch."""
    B, Cin, H, W = x_nchw.shape
    P = H * W
    Cout = p["conv"]["w"].shape[0]
    patches = _im2col_3x3(x_nchw)                                       # (B, 9*Cin, P)
    K = patches.shape[1]
    w_mat = jnp.transpose(p["conv"]["w"], (0, 2, 3, 1)).reshape(Cout, K)
    if scale_shift is None:
        sc = jnp.zeros((B, Cout, 1), F32)
        sh = jnp.zeros((B, Cout, 1), F32)
    else:
        sc = scale_shift[:, :Cout].reshape(B, Cout, 1).astype(F32)
        sh = scale_shift[:, Cout:].reshape(B, Cout, 1).astype(F32)
    out = pl.pallas_call(
        functools.partial(_conv_gn_film_silu_kernel, groups=NUM_GROUPS,
                          out_mult=out_mult, eps=1e-5),
        grid=(B,),
        in_specs=[
            pl.BlockSpec((1, K, P), lambda i: (i, 0, 0)),
            pl.BlockSpec((Cout, K), lambda i: (0, 0)),
            pl.BlockSpec((Cout, 1), lambda i: (0, 0)),
            pl.BlockSpec((Cout, 1), lambda i: (0, 0)),
            pl.BlockSpec((Cout, 1), lambda i: (0, 0)),
            pl.BlockSpec((1, Cout, 1), lambda i: (i, 0, 0)),
            pl.BlockSpec((1, Cout, 1), lambda i: (i, 0, 0)),
        ],
        out_specs=pl.BlockSpec((1, Cout, P), lambda i: (i, 0, 0)),
        out_shape=jax.ShapeDtypeStruct((B, Cout, P), F32),
        compiler_params=pltpu.CompilerParams(dimension_semantics=("parallel",)),
    )(patches.astype(F32), w_mat.astype(F32), p["conv"]["b"].reshape(Cout, 1).astype(F32),
      p["gamma"].reshape(Cout, 1).astype(F32), p["beta"].reshape(Cout, 1).astype(F32), sc, sh)
    return out.reshape(B, Cout, H, W)


# ----------------------------- plain conv kernel (conv_in / conv_out / resolution convs) --------
def _conv_kernel(p_ref, w_ref, b_ref, o_ref):
    o_ref[0] = jnp.dot(w_ref[...], p_ref[0], preferred_element_type=jnp.float32) + b_ref[...]


def conv2d(x_nchw, w, b, mode="3x3"):
    """Plain conv: 3x3 pad1 ('3x3'), 4x4 stride2 pad1 ('down4x4') or nearest-2x up + 3x3 ('up3x3')."""
    if mode == "up3x3":
        x_nchw = jnp.repeat(jnp.repeat(x_nchw, 2, axis=2), 2, axis=3)
    B, Cin, H, W = x_nchw.shape
    Cout = w.shape[0]
    if mode == "down4x4":
        patches = _im2col_4x4_s2(x_nchw)
        Ho, Wo = H // 2, W // 2
    else:
        patches = _im2col_3x3(x_nchw)
        Ho, Wo = H, W
    K = patches.shape[1]
    P = Ho * Wo
    w_mat = jnp.transpose(w, (0, 2, 3, 1)).reshape(Cout, K)
    out = pl.pallas_call(
        _conv_kernel,
        grid=(B,),
        in_specs=[pl.BlockSpec((1, K, P), lambda i: (i, 0, 0)),
                  pl.BlockSpec((Cout, K), lambda i: (0, 0)),
                  pl.BlockSpec((Cout, 1), lambda i: (0, 0))],
        out_specs=pl.BlockSpec((1, Cout, P), lambda i: (i, 0, 0)),
        out_shape=jax.ShapeDtypeStruct((B, Cout, P), F32),
        compiler_params=pltpu.CompilerParams(dimension_semantics=("parallel",)),
    )(patches.astype(F32), w_mat.astype(F32), b.reshape(Cout, 1).astype(F32))
    return out.reshape(B, Cout, Ho, Wo)


# ----------------------------- attention kernels -------------------------------------------------
def _ln_proj_kernel(x_ref, g_ref, be_ref, w_ref, b_ref, o_ref, *, use_ln, eps):
    x = x_ref[0]                                      # (L, Din)
    if use_ln:
        n = x.shape[-1]
        mean = jnp.sum(x, axis=-1, keepdims=True) / n
        var = jnp.sum((x - mean) ** 2, axis=-1, keepdims=True) / n
        x = (x - mean) * jax.lax.rsqrt(var + eps) * g_ref[...] + be_ref[...]
    o_ref[0] = jnp.dot(x, w_ref[...], preferred_element_type=jnp.float32) + b_ref[...]


def ln_proj(x_bld, gamma, beta, w, b, use_ln, eps=1e-5):
    """Optional LayerNorm fused with a linear projection; w has PyTorch (Dout, Din) layout."""
    B, L, Din = x_bld.shape
    Dout = w.shape[0]
    return pl.pallas_call(
        functools.partial(_ln_proj_kernel, use_ln=use_ln, eps=eps),
        grid=(B,),
        in_specs=[pl.BlockSpec((1, L, Din), lambda i: (i, 0, 0)),
                  pl.BlockSpec((1, Din), lambda i: (0, 0)),
                  pl.BlockSpec((1, Din), lambda i: (0, 0)),
                  pl.BlockSpec((Din, Dout), lambda i: (0, 0)),
                  pl.BlockSpec((1, Dout), lambda i: (0, 0))],
        out_specs=pl.BlockSpec((1, L, Dout), lambda i: (i, 0, 0)),
        out_shape=jax.ShapeDtypeStruct((B, L, Dout), F32),
        compiler_params=pltpu.CompilerParams(dimension_semantics=("parallel",)),
    )(x_bld.astype(F32), gamma.reshape(1, Din).astype(F32), beta.reshape(1, Din).astype(F32),
      jnp.transpose(w).astype(F32), b.reshape(1, Dout).astype(F32))


def _attn_kernel(q_ref, kv_ref, o_ref, *, num_heads, scale):
    q = q_ref[0]                                      # (Lq, E)
    kv = kv_ref[0]                                    # (Lk, 2E)  [K | V]
    E = q.shape[-1]
    dh = E // num_heads
    outs = []
    for h in range(num_heads):                        # static unroll; all heads stay in VMEM
        qh = q[:, h * dh:(h + 1) * dh]
        kh = kv[:, h * dh:(h + 1) * dh]
        vh = kv[:, E + h * dh:E + (h + 1) * dh]
        s = jax.lax.dot_general(qh, kh, (((1,), (1,)), ((), ())),
                                preferred_element_type=jnp.float32) * scale
        m = jnp.max(s, axis=-1, keepdims=True)
        p = jnp.exp(s - m)
        l = jnp.sum(p, axis=-1, keepdims=True)
        p = p * pl.reciprocal(l, approx=False)        # single reciprocal + multiply
        outs.append(jnp.dot(p, vh, preferred_element_type=jnp.float32))
    o_ref[0] = jnp.concatenate(outs, axis=-1)


def attention(q, kv, num_heads):
    """q:(B,Lq,E), kv:(B,Lk,2E) -> (B,Lq,E); grid over batch, heads looped in-kernel."""
    B, Lq, E = q.shape
    Lk = kv.shape[1]
    return pl.pallas_call(
        functools.partial(_attn_kernel, num_heads=num_heads,
                          scale=1.0 / math.sqrt(E // num_heads)),
        grid=(B,),
        in_specs=[pl.BlockSpec((1, Lq, E), lambda i: (i, 0, 0)),
                  pl.BlockSpec((1, Lk, 2 * E), lambda i: (i, 0, 0))],
        out_specs=pl.BlockSpec((1, Lq, E), lambda i: (i, 0, 0)),
        out_shape=jax.ShapeDtypeStruct((B, Lq, E), F32),
        compiler_params=pltpu.CompilerParams(dimension_semantics=("parallel",)),
    )(q.astype(F32), kv.astype(F32))


def _attn_out_kernel(a_ref, w_ref, b_ref, r_ref, o_ref):
    o_ref[0] = (jnp.dot(a_ref[0], w_ref[...], preferred_element_type=jnp.float32)
                + b_ref[...] + r_ref[0])


def attn_out_proj(attn, out_w, out_b, residual):
    """Output projection fused with the residual add."""
    B, L, E = attn.shape
    return pl.pallas_call(
        _attn_out_kernel,
        grid=(B,),
        in_specs=[pl.BlockSpec((1, L, E), lambda i: (i, 0, 0)),
                  pl.BlockSpec((E, E), lambda i: (0, 0)),
                  pl.BlockSpec((1, E), lambda i: (0, 0)),
                  pl.BlockSpec((1, L, E), lambda i: (i, 0, 0))],
        out_specs=pl.BlockSpec((1, L, E), lambda i: (i, 0, 0)),
        out_shape=jax.ShapeDtypeStruct((B, L, E), F32),
        compiler_params=pltpu.CompilerParams(dimension_semantics=("parallel",)),
    )(attn.astype(F32), jnp.transpose(out_w).astype(F32),
      out_b.reshape(1, E).astype(F32), residual.astype(F32))


# ----------------------------- forward-process / loss kernels -----------------------------------
def _apply_noise_kernel(img_ref, noise_ref, ab_ref, o_ref):
    ab = ab_ref[...]
    o_ref[...] = jnp.sqrt(ab) * img_ref[...] + jnp.sqrt(1.0 - ab) * noise_ref[...]


def pallas_apply_noise(images_nchw, noise_nchw, alpha_bars):
    B = images_nchw.shape[0]
    img2 = images_nchw.reshape(B, -1).astype(F32)
    noi2 = noise_nchw.reshape(B, -1).astype(F32)
    ab2 = alpha_bars.reshape(B, 1).astype(F32)
    out = pl.pallas_call(
        _apply_noise_kernel, out_shape=jax.ShapeDtypeStruct(img2.shape, F32)
    )(img2, noi2, ab2)
    return out.reshape(images_nchw.shape)


def _mse_kernel(a_ref, b_ref, o_ref):
    d = a_ref[...] - b_ref[...]
    o_ref[0, 0] = jnp.sum(d * d)


def pallas_mse(a, b):
    a2 = a.reshape(a.shape[0], -1).astype(F32)
    b2 = b.reshape(b.shape[0], -1).astype(F32)
    s = pl.pallas_call(
        _mse_kernel,
        out_shape=jax.ShapeDtypeStruct((1, 1), F32),
        out_specs=pl.BlockSpec(memory_space=pltpu.MemorySpace.SMEM),
    )(a2, b2)
    return s[0, 0] / a.size


# ----------------------------- model blocks ------------------------------------------------------
def resnet_block(x_nchw, p, t_emb, pooled_text):
    ts = dense(t_emb, p["time"], act_in="silu")        # (B, 2C), SiLU fused into the GEMM
    xs = dense(pooled_text, p["text"], act_in="silu")  # (B, 2C)
    h = conv_block(x_nchw, p["block1"], ts)
    h = conv_block(h, p["block2"], xs)
    # Matches the reference exactly: `x` is reassigned before `self.residual(x) + x` and the
    # residual is Identity (in_channels == out_channels) -> output = 2 * block3(x).
    # The doubling is fused into block3's epilogue (no separate add kernel).
    return conv_block(h, p["block3"], None, out_mult=2.0)


def self_attention_block(x_nchw, p):
    B, C, H, W = x_nchw.shape
    L = H * W
    xr = jnp.transpose(x_nchw.reshape(B, C, L), (0, 2, 1))             # (B, L, C)
    qkv = ln_proj(xr, p["ln_g"], p["ln_b"], p["mha"]["in_w"], p["mha"]["in_b"], use_ln=True)
    out = attention(qkv[..., :C], qkv[..., C:], NUM_HEADS)
    out = attn_out_proj(out, p["mha"]["out_w"], p["mha"]["out_b"], xr)
    return jnp.transpose(out, (0, 2, 1)).reshape(B, C, H, W)


def cross_attention_block(x_nchw, p, t_emb, text_emb):
    B, C, H, W = x_nchw.shape
    E = C
    L = H * W
    xr = jnp.transpose(x_nchw.reshape(B, C, L), (0, 2, 1))             # (B, L, C)
    t = dense_ln(t_emb, p["time"], p["time_ln_g"], p["time_ln_b"], act_in="silu")      # (B, E)
    Bt, Lt, Dt = text_emb.shape
    tx = dense_ln(text_emb.reshape(Bt * Lt, Dt), p["text"], p["text_ln_g"], p["text_ln_b"],
                  act_in="silu").reshape(B, Lt, E)
    context = jnp.concatenate([t[:, None, :], tx], axis=1)             # (B, 1+Lt, E)
    in_w, in_b = p["mha"]["in_w"], p["mha"]["in_b"]
    q = ln_proj(xr, p["pre_ln_g"], p["pre_ln_b"], in_w[:E], in_b[:E], use_ln=True)     # (B, L, E)
    kv = ln_proj(context, jnp.ones((E,), F32), jnp.zeros((E,), F32),
                 in_w[E:], in_b[E:], use_ln=False)                     # (B, 1+Lt, 2E)
    out = attention(q, kv, NUM_HEADS)
    out = attn_out_proj(out, p["mha"]["out_w"], p["mha"]["out_b"], xr)
    return jnp.transpose(out, (0, 2, 1)).reshape(B, C, H, W)


def denoising_block(x_nchw, p, t_emb, text_emb, pooled_text):
    x = x_nchw
    for rp in p["resnet"]:
        x = resnet_block(x, rp, t_emb, pooled_text)
    if p["self_attn"] is not None:
        x = self_attention_block(x, p["self_attn"])
    if p["cross_attn"] is not None:
        x = cross_attention_block(x, p["cross_attn"], t_emb, text_emb)
    conv_mode = {"none": "3x3", "down": "down4x4", "up": "up3x3"}[p["mode"]]
    out = conv2d(x, p["res_conv"]["w"], p["res_conv"]["b"], mode=conv_mode)
    return out, x


def sinusoidal_embedding(steps, dim):
    half = dim // 2
    freqs = jnp.exp(-math.log(10000.0) * jnp.arange(half, dtype=F32) / (half - 1))
    args = steps.astype(F32)[:, None] * freqs[None, :]
    return jnp.concatenate([jnp.sin(args), jnp.cos(args)], axis=-1)


def denoising_model(params, corrupted_nchw, diffusion_steps, text_embeddings):
    t = sinusoidal_embedding(diffusion_steps, TIME_EMBED_DIM)
    t = dense(t, params["time_mlp"]["lin1"], act_out="gelu")           # GELU fused
    t = dense(t, params["time_mlp"]["lin2"])
    pooled = jnp.mean(text_embeddings, axis=1)

    x = conv2d(corrupted_nchw, params["conv_in"]["w"], params["conv_in"]["b"], mode="3x3")
    encoded = []
    for lp in params["encoder"]:
        x, st = denoising_block(x, lp, t, text_embeddings, pooled)
        encoded.append(st)
    x, _ = denoising_block(x, params["mid"], t, text_embeddings, pooled)
    num_scales = len(params["encoder"])
    for i, lp in enumerate(params["decoder"]):
        state = jnp.concatenate([x, encoded[num_scales - i - 1]], axis=1)
        x, _ = denoising_block(state, lp, t, text_embeddings, pooled)
    return conv2d(x, params["conv_out"]["w"], params["conv_out"]["b"], mode="3x3")


def diffusion_forward(params, images_nchw, text_embeddings, key_steps, key_noise):
    """ConditionalDiffusionModel.forward: returns {'loss': mse(inferred_noise, noise)}."""
    B = images_nchw.shape[0]
    images = 2.0 * images_nchw - 1.0
    # torch.randint(0, T-1) has an exclusive upper bound -> steps in [0, T-2]; matched here.
    diffusion_steps = jax.random.randint(key_steps, (B,), 0, NUM_DIFFUSION_STEPS - 1)
    noise = jax.random.normal(key_noise, images.shape, F32)
    alpha_bars = ALPHA_BARS[diffusion_steps]
    corrupted = pallas_apply_noise(images, noise, alpha_bars)
    inferred = denoising_model(params, corrupted, diffusion_steps, text_embeddings)
    return {"loss": pallas_mse(inferred, noise)}


# ----------------------------- deterministic parameter init -------------------------------------
class KeyGen:
    def __init__(self, key):
        self.key = key

    def __call__(self):
        self.key, sub = jax.random.split(self.key)
        return sub


def init_linear(kg, din, dout, std=0.02):
    return {"w": jax.random.normal(kg(), (dout, din), F32) * std, "b": jnp.zeros((dout,), F32)}


def init_conv(kg, cin, cout, k, std=0.05):
    return {"w": jax.random.normal(kg(), (cout, cin, k, k), F32) * std,
            "b": jnp.zeros((cout,), F32)}


def init_conv_block(kg, cin, cout):
    return {"conv": init_conv(kg, cin, cout, 3),
            "gamma": jnp.ones((cout,), F32), "beta": jnp.zeros((cout,), F32)}


def init_resnet(kg, c):
    return {"time": init_linear(kg, TIME_EMBED_DIM, 2 * c),
            "text": init_linear(kg, TEXT_EMBED_DIM, 2 * c),
            "block1": init_conv_block(kg, c, c),
            "block2": init_conv_block(kg, c, c),
            "block3": init_conv_block(kg, c, c)}


def init_mha(kg, e):
    return {"in_w": jax.random.normal(kg(), (3 * e, e), F32) * 0.02,
            "in_b": jnp.zeros((3 * e,), F32),
            "out_w": jax.random.normal(kg(), (e, e), F32) * 0.02,
            "out_b": jnp.zeros((e,), F32)}


def init_self_attn(kg, e):
    return {"ln_g": jnp.ones((e,), F32), "ln_b": jnp.zeros((e,), F32), "mha": init_mha(kg, e)}


def init_cross_attn(kg, e):
    return {"time": init_linear(kg, TIME_EMBED_DIM, e),
            "time_ln_g": jnp.ones((e,), F32), "time_ln_b": jnp.zeros((e,), F32),
            "text": init_linear(kg, TEXT_EMBED_DIM, e),
            "text_ln_g": jnp.ones((e,), F32), "text_ln_b": jnp.zeros((e,), F32),
            "pre_ln_g": jnp.ones((e,), F32), "pre_ln_b": jnp.zeros((e,), F32),
            "mha": init_mha(kg, e)}


def init_denoising_block(kg, cin, cout, use_sa, use_ca, mode):
    p = {"resnet": [init_resnet(kg, cin) for _ in range(NUM_BLOCKS_PER_SCALE)],
         "self_attn": init_self_attn(kg, cin) if use_sa else None,
         "cross_attn": init_cross_attn(kg, cin) if use_ca else None,
         "mode": mode}
    k = 4 if mode == "down" else 3
    p["res_conv"] = init_conv(kg, cin, cout, k)
    return p


def init_model_params(key):
    kg = KeyGen(key)
    out_channels = [m * INITIAL_CHANNELS for m in SCALE_MULT]
    in_channels = [INITIAL_CHANNELS] + out_channels[:-1]
    num_scales = len(SCALE_MULT)
    params = {"time_mlp": {"lin1": init_linear(kg, TIME_EMBED_DIM, TIME_EMBED_DIM),
                           "lin2": init_linear(kg, TIME_EMBED_DIM, TIME_EMBED_DIM)},
              "conv_in": init_conv(kg, 3, INITIAL_CHANNELS, 3),
              "conv_out": init_conv(kg, INITIAL_CHANNELS, 3, 3),
              "encoder": [], "decoder": []}
    for i in range(num_scales):
        is_last = i == num_scales - 1
        params["encoder"].append(init_denoising_block(
            kg, in_channels[i], out_channels[i],
            use_sa=i in SELF_ATTN_IDS, use_ca=i in CROSS_ATTN_IDS,
            mode="none" if is_last else "down"))
    params["mid"] = init_denoising_block(kg, in_channels[-1], out_channels[-1],
                                         use_sa=True, use_ca=True, mode="none")
    for i in reversed(range(num_scales)):
        is_last = i == 0
        params["decoder"].append(init_denoising_block(
            kg, in_channels[i] + out_channels[i], in_channels[i],
            use_sa=i in SELF_ATTN_IDS, use_ca=i in CROSS_ATTN_IDS,
            mode="none" if is_last else "up"))
    return params


# ----------------------------- main --------------------------------------------------------------
if __name__ == "__main__":
    key = jax.random.PRNGKey(0)
    k_img, k_txt, k_step, k_noise = jax.random.split(key, 4)

    images = jax.random.uniform(k_img, (BATCH, 3, RESOLUTION, RESOLUTION), F32)      # batch.images (NCHW)
    text_embeddings = jax.random.normal(k_txt, (BATCH, TEXT_SEQ, TEXT_EMBED_DIM), F32)

    params = init_model_params(jax.random.PRNGKey(42))

    out = diffusion_forward(params, images, text_embeddings, k_step, k_noise)
    loss = jax.block_until_ready(out["loss"])
    assert loss.shape == () and jnp.isfinite(loss)
    print("KERNEL_OK")
</pallas_src>

<mosaic_0001>
module attributes {stable_mosaic.version = 11 : i64} {
  func.func @_apply_noise_kernel(%arg0: memref<2x768xf32, #tpu.memory_space<vmem>>, %arg1: memref<2x768xf32, #tpu.memory_space<vmem>>, %arg2: memref<2x1xf32, #tpu.memory_space<vmem>>, %arg3: memref<2x768xf32, #tpu.memory_space<vmem>>) attributes {dimension_semantics = [], scalar_prefetch = 0 : i64, scratch_operands = 0 : i64, tpu.core_type = #tpu.core_type<tc>} {
    %c0 = arith.constant 0 : index
    %c0_0 = arith.constant 0 : index
    %0 = vector.load %arg2[%c0, %c0_0] : memref<2x1xf32, #tpu.memory_space<vmem>>, vector<2x1xf32>
    %1 = math.sqrt %0 : vector<2x1xf32>
    %c0_1 = arith.constant 0 : index
    %c0_2 = arith.constant 0 : index
    %2 = vector.load %arg0[%c0_1, %c0_2] : memref<2x768xf32, #tpu.memory_space<vmem>>, vector<2x768xf32>
    %3 = vector.broadcast %1 : vector<2x1xf32> to vector<2x768xf32>
    %4 = arith.mulf %3, %2 : vector<2x768xf32>
    %cst = arith.constant 1.000000e+00 : f32
    %5 = vector.broadcast %cst : f32 to vector<2x1xf32>
    %6 = arith.subf %5, %0 : vector<2x1xf32>
    %7 = math.sqrt %6 : vector<2x1xf32>
    %c0_3 = arith.constant 0 : index
    %c0_4 = arith.constant 0 : index
    %8 = vector.load %arg1[%c0_3, %c0_4] : memref<2x768xf32, #tpu.memory_space<vmem>>, vector<2x768xf32>
    %9 = vector.broadcast %7 : vector<2x1xf32> to vector<2x768xf32>
    %10 = arith.mulf %9, %8 : vector<2x768xf32>
    %11 = arith.addf %4, %10 : vector<2x768xf32>
    %c0_5 = arith.constant 0 : index
    %c0_6 = arith.constant 0 : index
    %12 = vector.load %arg3[%c0_5, %c0_6] : memref<2x768xf32, #tpu.memory_space<vmem>>, vector<2x768xf32>
    tpu.vector_store %arg3[%c0_5, %c0_6], %11 {strides = array<i32>} : memref<2x768xf32, #tpu.memory_space<vmem>>, vector<2x768xf32>,
    return
  }
}

</mosaic_0001>

<bundles_post_ra>
// kernel: tpu_custom_call.1
= control target key start
LH: loop header
LB: loop body
LE: loop exit
PB: predicated region body
PF: predicated region fallthrough
CT: control target
= control target key end

     0   :  { %8 = vsyncpa [#allocation3], 0  ;;  %s322_s0 = inlined_call_operand.hbm [shape: f32[2,768], index: 0, kind: input, shape index: {}]   ;;  %s323_s1 = inlined_call_operand.hbm [shape: f32[2,768], index: 1, kind: input, shape index: {}]   ;;  %s324_s2 = inlined_call_operand.vmem [shape: f32[2,1], index: 2, kind: input, shape index: {}]   ;;  %s325_s3 = inlined_call_operand.hbm [shape: f32[2,768], index: 3, kind: output, shape index: {}]  }
   0x1   :  { %9 = vsyncpa [#allocation6], 0 }
   0x2   :  { %10 = vsyncpa [#allocation4], 0  ;;  %s285_s12 = smov [#allocation2]   ;;  %s286_s14 = smov [#allocation5]  }
   0x3   :  { %s17_s13 = sshll.u32 %s285_s12, 4  ;;  %s27_s15 = sshll.u32 %s286_s14, 4  ;;  %s18_s13 = int_to_ptr.vmem [resolvable:$true] %s17_s13  ;;  %s28_s15 = int_to_ptr.vmem [resolvable:$true] %s27_s15 }
   0x4   :  { %s227_s16 = scalar_lea.vmem %s18_s13, 192  ;;  %p232_p1 = scmp.lt.s32.totalorder %s18_s13, %s18_s13 }
   0x5   :  { %p228_p0 = scmp.ne.s32.totalorder %s18_s13, %s227_s16  ;;  %p233_p2 = scmp.lt.s32.totalorder %s227_s16, %s227_s16 }
   0x7   :  { %p234_p3 = por %p233_p2, %p232_p1 }
   0x9   :  { %p235_p4 = pnand %p234_p3, %p228_p0 }
   0xb   :  { %238 = shalt.err (!%p235_p4)
}
   0xc   :  { %20 = dma.hbm_to_vmem [thread:$0]  %s322_s0, 192, %s18_s13, [#allocation3]  }
   0xd   :  { %s247_s19 = scalar_lea.vmem %s28_s15, 192  ;;  %p252_p6 = scmp.lt.s32.totalorder %s28_s15, %s28_s15 }
   0xe   :  { %p248_p5 = scmp.ne.s32.totalorder %s28_s15, %s247_s19  ;;  %p253_p7 = scmp.lt.s32.totalorder %s247_s19, %s247_s19 }
  0x10   :  { %p254_p8 = por %p253_p7, %p252_p6 }
  0x12   :  { %p255_p9 = pnand %p254_p8, %p248_p5 }
  0x14   :  { %258 = shalt.err (!%p255_p9)
}
  0x15   :  { %30 = dma.hbm_to_vmem [thread:$0]  %s323_s1, 192, %s28_s15, [#allocation6]  }
  0x16   :  { %279 = dma.done.wait [#allocation3], 192  }
  0x17   :  { %280 = vsyncadd [#allocation3], 4294967104 }
  0x18   :  { %281 = dma.done.wait [#allocation6], 192  }
  0x19   :  { %282 = vsyncadd [#allocation6], 4294967104  ;;  %v287_v0 = vmov 0   ;;  %v39_v1 = vld [vmem:[%s324_s2] sm:$0x3]  ;;  %v60_v15 = vlaneseq  ;;  %v101_v19 = vld [vmem:[#allocation5] sm:$0xff] }
  0x1a   :  { %212 = vset.pattern.permute.xlu0 %v287_v0  ;;  %215 = vrsqrt.f32 %v39_v1  ;;  %v93_v2 = vsub.f32 1.0, %v39_v1  ;;  %vm42_vm0 = vcmp.eq.f32.partialorder %v39_v1, inf  ;;  %v45_v4 = vand.u32 2147483648, %v39_v1  ;;  %v47_v18 = vld [vmem:[#allocation2] sm:$0xff]  ;;  %s289_s0 = smov [#allocation7]  }
  0x1b   :  { %vm44_vm1 = vcmp.eq.f32.partialorder %v39_v1, 0.0  ;;  %v288_v13 = vmov 1983009808   ;;  %v61_v17 = vshrl.u32 %v60_v15, 7  ;;  %v56_v20 = vcombine.high %v47_v18, %v47_v18  ;;  %s194_s1 = sshll.u32 %s289_s0, 4  ;;  %s195_s1 = int_to_ptr.vmem [resolvable:$true] %s194_s1 }
  0x1c   :  { %217 = vrsqrt.f32 %v93_v2  ;;  %vm96_vm2 = vcmp.eq.f32.partialorder %v93_v2, inf  ;;  %v99_v8 = vand.u32 2147483648, %v93_v2  ;;  %vm98_vm3 = vcmp.eq.f32.partialorder %v93_v2, 0.0  ;;  %s259_s2 = scalar_lea.vmem %s195_s1, 192  ;;  %p264_p11 = scmp.lt.s32.totalorder %s195_s1, %s195_s1 }
  0x1d   :  { %v58_v14 = vunpack.c.l.s4 %v288_v13  ;;  %v110_v22 = vcombine.high %v101_v19, %v101_v19  ;;  %v204_v27 = vld.sshfl [vmem:[#allocation2 + $0x8] sm:$0x33 pattern:$0x76325410]  ;;  %p260_p10 = scmp.ne.s32.totalorder %s195_s1, %s259_s2  ;;  %p265_p12 = scmp.lt.s32.totalorder %s259_s2, %s259_s2 }
  0x1e   :  { %v205_v28 = vld.sshfl [vmem:[#allocation5 + $0x8] sm:$0x33 pattern:$0x76325410]  ;;  %v80_v35 = vcombine.high %v204_v27, %v204_v27 }
  0x1f   :  { %v59_v16 = vunpack.c.0.s8 %v58_v14  ;;  %v134_v34 = vcombine.high %v205_v28, %v205_v28  ;;  %p266_p13 = por %p265_p12, %p264_p11 }
  0x21   :  { %v62_v21 = vsub.s32 %v59_v16, %v61_v17  ;;  %p267_p0 = pnand %p266_p13, %p260_p10 }
  0x23   :  { %v63_v23 = vrot.slane %v47_v18, %v62_v21  ;;  %v70_v24 = vrot.slane %v56_v20, %v62_v21  ;;  %v117_v25 = vrot.slane %v101_v19, %v62_v21  ;;  %v124_v26 = vrot.slane %v110_v22, %v62_v21 }
  0x25   :  { %v71_v29 = vcombine.high %v63_v23, %v63_v23  ;;  %v72_v30 = vcombine.high %v70_v24, %v70_v24  ;;  %v125_v32 = vcombine.high %v117_v25, %v117_v25  ;;  %v126_v33 = vcombine.high %v124_v26, %v124_v26 }
  0x27   :  { %v216_v3 = vpop.eup %215 }
  0x28   :  { %v41_v5 = vmul.f32 %v216_v3, %v39_v1 }
  0x29   :  { %v218_v6 = vpop.eup %217 }
  0x2a   :  { %v43_v7 = vsel %vm42_vm0, %v39_v1, %v41_v5  ;;  %v95_v10 = vmul.f32 %v218_v6, %v93_v2 }
  0x2b   :  { %v46_v9 = vsel %vm44_vm1, %v45_v4, %v43_v7 }
  0x2c   :  { %51 = vperm.xlu0 %212, %v46_v9   ;;  %v97_v11 = vsel %vm96_vm2, %v93_v2, %v95_v10 }
  0x2d   :  { %v100_v12 = vsel %vm98_vm3, %v99_v8, %v97_v11 }
  0x30   :  { %105 = vperm.xlu0 %212, %v100_v12  }
  0xa7   :  { %v52_v31 = vpop.permute.xlu0 %51 }
  0xa8   :  { %v87_v36 = vmul.f32 %v63_v23, %v52_v31  ;;  %v88_v37 = vmul.f32 %v71_v29, %v52_v31  ;;  %v89_v38 = vmul.f32 %v70_v24, %v52_v31  ;;  %v90_v39 = vmul.f32 %v72_v30, %v52_v31 }
  0xa9   :  { %v91_v47 = vmul.f32 %v204_v27, %v52_v31  ;;  %v92_v48 = vmul.f32 %v80_v35, %v52_v31 }
  0xab   :  { %v106_v40 = vpop.permute.xlu0 %105 }
  0xac   :  { %v141_v41 = vmul.f32 %v117_v25, %v106_v40  ;;  %v142_v42 = vmul.f32 %v125_v32, %v106_v40  ;;  %v143_v43 = vmul.f32 %v124_v26, %v106_v40  ;;  %v144_v44 = vmul.f32 %v126_v33, %v106_v40 }
  0xad   :  { %v145_v45 = vmul.f32 %v205_v28, %v106_v40  ;;  %v146_v46 = vmul.f32 %v134_v34, %v106_v40 }
  0xae   :  { %v147_v49 = vadd.f32 %v141_v41, %v87_v36  ;;  %v148_v50 = vadd.f32 %v142_v42, %v88_v37  ;;  %v149_v51 = vadd.f32 %v143_v43, %v89_v38  ;;  %v150_v52 = vadd.f32 %v144_v44, %v90_v39 }
  0xaf   :  { %v151_v53 = vadd.f32 %v145_v45, %v91_v47  ;;  %v152_v54 = vadd.f32 %v146_v46, %v92_v48 }
  0xb0   :  { %v159_v55 = vcombine.low %v147_v49, %v148_v50  ;;  %v160_v56 = vcombine.low %v149_v51, %v150_v52 }
  0xb1   :  { %v176_v57 = vcombine.low %v151_v53, %v152_v54 }
  0xb2   :  { %v167_v58 = vrot.slane %v159_v55, %v62_v21  ;;  %v174_v59 = vrot.slane %v160_v56, %v62_v21 }
  0xb3   :  { %206 = vst.sshfl [vmem:[#allocation7 + $0x8] sm:$0x33 pattern:$0x76325410] %v176_v57 }
  0xb4   :  { %v175_v60 = vcombine.low %v167_v58, %v174_v59 }
  0xb6   :  { %186 = vst [vmem:[#allocation7] sm:$0xff] %v175_v60 }
  0xb7   :  { %270 = shalt.err (!%p267_p0)
}
  0xb8   :  { %197 = dma.vmem_to_hbm [thread:$0]  %s195_s1, 192, %s325_s3, [#allocation4]  }
  0xb9   :  { %283 = dma.done.wait [#allocation4], 192  }
  0xba   :  { %284 = vsyncadd [#allocation4], 4294967104 }
  0xbb   :  { %201 = vsyncpa [#allocation3], 1 }
  0xbc   :  { %202 = vsyncpa [#allocation6], 1 }
  0xbd   :  { %203 = vsyncpa [#allocation4], 1 }

</bundles_post_ra>
